<compile_context>
chip_gen: v7x
topology: tpu7x:2x2x1
jax: 0.10.0
libtpu: 0.0.40
codegen_flags: <defaults>
</compile_context>

<pallas_src>
import functools

import jax
import jax.numpy as jnp
import numpy as np
from jax.experimental import pallas as pl
from jax.experimental.pallas import tpu as pltpu

GAMMA = 2.0      # hyper_params['fl_gamma'] (== 2 -> pow replaced by squaring)
EPS = 1e-07      # torch.clamp bounds in FocLoss_ClassWeights
H1_PAD = 128     # Linear(H,100) output padded to 128 features (tile aligned)
H2_PAD = 64      # Linear(100,50) output padded to 64 features

_SMEM = pl.BlockSpec(memory_space=pltpu.MemorySpace.SMEM)


# ----------------------------- Pallas kernel ------------------------------- #

def fused_head_loss_kernel(n_ref, cw_ref, b3_ref,            # SMEM scalars
                           x_ref, w1_ref, b1_ref, w2_ref, b2_ref, w3_ref, y_ref,
                           logits_ref, bce_ref):
    """Fused fine_tuning_layers + FocLoss_ClassWeights for one batch tile.

    x_ref is a natural-layout [TN, H] bf16 tile; W1 is contracted against its
    H axis so the batch ends up on the lane axis of every intermediate and
    output (lane-dense stores), with no wrapper-side transpose.
    """
    tn = x_ref.shape[0]

    # Linear(H,100) -> ReLU.  bf16 MXU operands, f32 accumulation.
    h1 = jax.lax.dot_general(
        w1_ref[...], x_ref[...],
        dimension_numbers=(((1,), (1,)), ((), ())),
        preferred_element_type=jnp.float32) + b1_ref[...]        # [128, TN]
    h1 = jnp.maximum(h1, 0.0)
    # Dropout(0.2) is identity at inference (predict() runs under no_grad).

    # Linear(100,50) -> ReLU.  Tiny f32 matmul on the already-resident h1.
    h2 = jnp.dot(w2_ref[...], h1, preferred_element_type=jnp.float32) + b2_ref[...]
    h2 = jnp.maximum(h2, 0.0)                                    # [64, TN]

    # Linear(50,1): VPU broadcast-mul + cross-sublane reduce (no N=1 matmul).
    z = jnp.sum(h2 * w3_ref[...], axis=0, keepdims=True) + b3_ref[0]   # [1, TN]
    logits = jax.nn.sigmoid(z)
    logits_ref[...] = logits                                     # lane-dense store

    # FocLoss_ClassWeights (gamma == 2): squares on the VALU, only log on EUP.
    # Entire epilogue stays f32 (EPS not representable in bf16).
    p = jnp.clip(logits, EPS, 1.0 - EPS)
    omp = 1.0 - p
    y = y_ref[...]
    w0 = cw_ref[0]    # class_weights[0]
    w1c = cw_ref[1]   # class_weights[1]
    bce = -(w1c * y * omp * omp * jnp.log(p)
            + w0 * (1.0 - y) * p * p * jnp.log(omp))
    lane = jax.lax.broadcasted_iota(jnp.int32, bce.shape, 1)
    gidx = pl.program_id(0) * tn + lane
    # Per-example masked losses; the mean is finished in the wrapper so the
    # batch grid axis stays "parallel" (no cross-step accumulator).
    bce_ref[...] = jnp.where(gidx < n_ref[0], bce, 0.0)


# ------------------------------ JAX wrappers ------------------------------- #

def pack_params(W1, b1, W2, b2, W3, b3):
    """Pad torch-layout Linear params (weights [out, in]) to tile-aligned
    shapes consumed by the kernel.  Zero padding is numerically inert.
    W1 is stored bf16 (MXU operand); everything else stays f32."""
    H = W1.shape[1]
    w1t = jnp.zeros((H1_PAD, H), jnp.bfloat16).at[:W1.shape[0], :].set(
        W1.astype(jnp.bfloat16))
    b1c = jnp.zeros((H1_PAD, 1), jnp.float32).at[:b1.shape[0], 0].set(b1)
    w2t = jnp.zeros((H2_PAD, H1_PAD), jnp.float32).at[:W2.shape[0], :W2.shape[1]].set(W2)
    b2c = jnp.zeros((H2_PAD, 1), jnp.float32).at[:b2.shape[0], 0].set(b2)
    w3c = jnp.zeros((H2_PAD, 1), jnp.float32).at[:W3.shape[1], 0].set(W3[0])
    b3s = jnp.reshape(b3, (1,)).astype(jnp.float32)
    return w1t, b1c, w2t, b2c, w3c, b3s


@functools.partial(jax.jit, static_argnames=("block_batch",))
def forward(cls_embedding, labels, packed_params, class_weights, *, block_batch=512):
    """Mirrors model_class.forward(input_ids, attention_mask, pos, labels):
    cls_embedding stands in for encoder(...).last_hidden_state[:, 0].
    Returns (loss, logits) like SequenceClassifierOutput."""
    w1t, b1c, w2t, b2c, w3c, b3s = packed_params
    B, H = cls_embedding.shape
    TN = block_batch
    BP = pl.cdiv(B, TN) * TN                         # lane-pad the batch
    n_tiles = BP // TN

    # Natural-layout pad + bf16 cast (halves activation DMA bytes).
    # TODO(synk): at production scale have the encoder emit the padded bf16
    # [BP, H] activation directly (or use allow_input_fusion) so this pad/cast
    # copy disappears from the HBM-bound path.
    x_pad = jnp.zeros((BP, H), jnp.bfloat16).at[:B, :].set(
        cls_embedding.astype(jnp.bfloat16))
    y_row = jnp.zeros((1, BP), jnp.float32).at[0, :B].set(labels)
    n_arr = jnp.array([B], dtype=jnp.int32)          # SMEM scalar, no recompile per B

    flops = (2 * H * H1_PAD + 2 * H1_PAD * H2_PAD + 2 * H2_PAD) * BP
    bytes_accessed = (BP * H * 2                      # bf16 activations in
                      + H1_PAD * H * 2                # bf16 W1
                      + (H2_PAD * H1_PAD + H1_PAD + H2_PAD + H2_PAD) * 4
                      + BP * 4 * 3)                   # y in, logits + bce out

    logits_row, bce_row = pl.pallas_call(
        fused_head_loss_kernel,
        out_shape=(jax.ShapeDtypeStruct((1, BP), jnp.float32),
                   jax.ShapeDtypeStruct((1, BP), jnp.float32)),
        grid=(n_tiles,),
        in_specs=[
            _SMEM,                                               # n (batch size)
            _SMEM,                                               # class_weights
            _SMEM,                                               # b3
            pl.BlockSpec((TN, H), lambda i: (i, 0)),             # x tile (bf16)
            pl.BlockSpec((H1_PAD, H), lambda i: (0, 0)),         # W1 (resident)
            pl.BlockSpec((H1_PAD, 1), lambda i: (0, 0)),         # b1
            pl.BlockSpec((H2_PAD, H1_PAD), lambda i: (0, 0)),    # W2
            pl.BlockSpec((H2_PAD, 1), lambda i: (0, 0)),         # b2
            pl.BlockSpec((H2_PAD, 1), lambda i: (0, 0)),         # w3
            pl.BlockSpec((1, TN), lambda i: (0, i)),             # labels tile
        ],
        out_specs=(pl.BlockSpec((1, TN), lambda i: (0, i)),      # logits tile
                   pl.BlockSpec((1, TN), lambda i: (0, i))),     # per-example loss
        compiler_params=pltpu.CompilerParams(
            dimension_semantics=("parallel",),
            vmem_limit_bytes=32 * 1024 * 1024),
        cost_estimate=pl.CostEstimate(flops=flops,
                                      transcendentals=4 * BP,
                                      bytes_accessed=bytes_accessed),
    )(n_arr, class_weights, b3s, x_pad, w1t, b1c, w2t, b2c, w3c, y_row)

    loss = jnp.sum(bce_row) * (1.0 / B)              # torch.mean over B examples
    return loss, logits_row[0, :B]                   # .view(-1) equivalent


# --------------------------------- main ------------------------------------ #

def _linear_init(key, fan_in, fan_out):
    """Deterministic torch.nn.Linear-style uniform init, torch layout [out, in]."""
    kw, kb = jax.random.split(key)
    bound = 1.0 / np.sqrt(fan_in)
    w = jax.random.uniform(kw, (fan_out, fan_in), jnp.float32, -bound, bound)
    b = jax.random.uniform(kb, (fan_out,), jnp.float32, -bound, bound)
    return w, b


if __name__ == "__main__":
    B, H = 130, 32   # batch, encoder hidden_size (small synthetic config)
    TN = 128         # small lane tile for the demo -> 2 grid steps, masked tail
                     # (production default block_batch=512 per review)

    key = jax.random.PRNGKey(0)
    k_x, k_y, k1, k2, k3 = jax.random.split(key, 5)

    # Stand-in for encoder(...).last_hidden_state[:, 0]
    # TODO(synk): pretrained HF transformer encoder is not translatable in-script.
    x = jax.random.normal(k_x, (B, H), jnp.float32)
    labels = jax.random.bernoulli(k_y, 0.3, (B,)).astype(jnp.float32)
    class_weights = jnp.array([0.4, 1.6], dtype=jnp.float32)   # [w_neg, w_pos]

    W1, b1 = _linear_init(k1, H, 100)
    W2, b2 = _linear_init(k2, 100, 50)
    W3, b3 = _linear_init(k3, 50, 1)
    packed = pack_params(W1, b1, W2, b2, W3, b3)

    loss, logits = forward(x, labels, packed, class_weights, block_batch=TN)
    jax.block_until_ready((loss, logits))

    # Pure-JAX reference (first layer uses the same bf16-rounded operands as
    # the kernel's MXU feed; everything else f32, torch layout, unpadded).
    xb = x.astype(jnp.bfloat16).astype(jnp.float32)
    W1b = W1.astype(jnp.bfloat16).astype(jnp.float32)
    h1 = jnp.maximum(xb @ W1b.T + b1, 0.0)
    h2 = jnp.maximum(h1 @ W2.T + b2, 0.0)
    ref_logits = jax.nn.sigmoid(h2 @ W3.T + b3).reshape(-1)
    p = jnp.clip(ref_logits, EPS, 1.0 - EPS)
    ref_loss = jnp.mean(-(class_weights[1] * labels * (1.0 - p) * (1.0 - p) * jnp.log(p)
                          + class_weights[0] * (1.0 - labels) * p * p * jnp.log(1.0 - p)))

    np.testing.assert_allclose(np.asarray(logits), np.asarray(ref_logits),
                               rtol=1e-5, atol=1e-5)
    np.testing.assert_allclose(np.asarray(loss), np.asarray(ref_loss),
                               rtol=1e-5, atol=1e-5)

    print("KERNEL_OK")
</pallas_src>

<mosaic_0001>
module attributes {stable_mosaic.version = 11 : i64} {
  func.func @fused_head_loss_kernel(%arg0: i32, %arg1: memref<1xi32, #tpu.memory_space<smem>>, %arg2: memref<2xf32, #tpu.memory_space<smem>>, %arg3: memref<1xf32, #tpu.memory_space<smem>>, %arg4: memref<128x32xbf16, #tpu.memory_space<vmem>>, %arg5: memref<128x32xbf16, #tpu.memory_space<vmem>>, %arg6: memref<128x1xf32, #tpu.memory_space<vmem>>, %arg7: memref<64x128xf32, #tpu.memory_space<vmem>>, %arg8: memref<64x1xf32, #tpu.memory_space<vmem>>, %arg9: memref<64x1xf32, #tpu.memory_space<vmem>>, %arg10: memref<1x128xf32, #tpu.memory_space<vmem>>, %arg11: memref<1x128xf32, #tpu.memory_space<vmem>>, %arg12: memref<1x128xf32, #tpu.memory_space<vmem>>) attributes {dimension_semantics = [#tpu.dimension_semantics<parallel>], iteration_bounds = array<i64: 2>, scalar_prefetch = 0 : i64, scratch_operands = 0 : i64, tpu.core_type = #tpu.core_type<tc>, window_params = [{transform_indices = @transform_0, window_bounds = array<i64: 1>}, {transform_indices = @transform_1, window_bounds = array<i64: 2>}, {transform_indices = @transform_2, window_bounds = array<i64: 1>}, {transform_indices = @transform_3, window_bounds = array<i64: 128, 32>}, {pipeline_mode = #tpu.pipeline_mode<synchronous>, transform_indices = @transform_4, window_bounds = array<i64: 128, 32>}, {pipeline_mode = #tpu.pipeline_mode<synchronous>, transform_indices = @transform_5, window_bounds = array<i64: 128, 1>}, {pipeline_mode = #tpu.pipeline_mode<synchronous>, transform_indices = @transform_6, window_bounds = array<i64: 64, 128>}, {pipeline_mode = #tpu.pipeline_mode<synchronous>, transform_indices = @transform_7, window_bounds = array<i64: 64, 1>}, {pipeline_mode = #tpu.pipeline_mode<synchronous>, transform_indices = @transform_8, window_bounds = array<i64: 64, 1>}, {transform_indices = @transform_9, window_bounds = array<i64: 1, 128>}, {transform_indices = @transform_10, window_bounds = array<i64: 1, 128>}, {transform_indices = @transform_11, window_bounds = array<i64: 1, 128>}]} {
    %c0 = arith.constant 0 : index
    %c0_0 = arith.constant 0 : index
    %0 = vector.load %arg5[%c0, %c0_0] : memref<128x32xbf16, #tpu.memory_space<vmem>>, vector<128x32xbf16>
    %c0_1 = arith.constant 0 : index
    %c0_2 = arith.constant 0 : index
    %1 = vector.load %arg4[%c0_1, %c0_2] : memref<128x32xbf16, #tpu.memory_space<vmem>>, vector<128x32xbf16>
    %cst = arith.constant dense<0.000000e+00> : vector<128x128xf32>
    %2 = tpu.matmul %0, %1, %cst {dimension_numbers = #tpu.dot_dimension_numbers<[1], [1], [0], [0], [0, 0, 1, 0], [], []>} : vector<128x32xbf16>, vector<128x32xbf16>, vector<128x128xf32> -> vector<128x128xf32>
    %c0_3 = arith.constant 0 : index
    %c0_4 = arith.constant 0 : index
    %3 = vector.load %arg6[%c0_3, %c0_4] : memref<128x1xf32, #tpu.memory_space<vmem>>, vector<128x1xf32>
    %4 = vector.broadcast %3 : vector<128x1xf32> to vector<128x128xf32>
    %5 = arith.addf %2, %4 : vector<128x128xf32>
    %cst_5 = arith.constant 0.000000e+00 : f32
    %6 = vector.broadcast %cst_5 : f32 to vector<128x128xf32>
    %7 = arith.maximumf %5, %6 : vector<128x128xf32>
    %c0_6 = arith.constant 0 : index
    %c0_7 = arith.constant 0 : index
    %8 = vector.load %arg7[%c0_6, %c0_7] : memref<64x128xf32, #tpu.memory_space<vmem>>, vector<64x128xf32>
    %cst_8 = arith.constant dense<0.000000e+00> : vector<64x128xf32>
    %9 = tpu.matmul %8, %7, %cst_8 {dimension_numbers = #tpu.dot_dimension_numbers<[1], [0], [0], [1], [0, 0, 1, 1], [], []>} : vector<64x128xf32>, vector<128x128xf32>, vector<64x128xf32> -> vector<64x128xf32>
    %c0_9 = arith.constant 0 : index
    %c0_10 = arith.constant 0 : index
    %10 = vector.load %arg8[%c0_9, %c0_10] : memref<64x1xf32, #tpu.memory_space<vmem>>, vector<64x1xf32>
    %11 = vector.broadcast %10 : vector<64x1xf32> to vector<64x128xf32>
    %12 = arith.addf %9, %11 : vector<64x128xf32>
    %cst_11 = arith.constant 0.000000e+00 : f32
    %13 = vector.broadcast %cst_11 : f32 to vector<64x128xf32>
    %14 = arith.maximumf %12, %13 : vector<64x128xf32>
    %c0_12 = arith.constant 0 : index
    %c0_13 = arith.constant 0 : index
    %15 = vector.load %arg9[%c0_12, %c0_13] : memref<64x1xf32, #tpu.memory_space<vmem>>, vector<64x1xf32>
    %16 = vector.broadcast %15 : vector<64x1xf32> to vector<64x128xf32>
    %17 = arith.mulf %14, %16 : vector<64x128xf32>
    %cst_14 = arith.constant dense<0.000000e+00> : vector<128xf32>
    %18 = vector.multi_reduction <add>, %17, %cst_14 [0] : vector<64x128xf32> to vector<128xf32>
    %19 = vector.shape_cast %18 : vector<128xf32> to vector<1x128xf32>
    %c0_15 = arith.constant 0 : index
    %20 = memref.load %arg3[%c0_15] : memref<1xf32, #tpu.memory_space<smem>>
    %21 = vector.broadcast %20 : f32 to vector<1x128xf32>
    %22 = arith.addf %19, %21 : vector<1x128xf32>
    %23 = arith.negf %22 : vector<1x128xf32>
    %24 = math.exp %23 : vector<1x128xf32>
    %cst_16 = arith.constant 1.000000e+00 : f32
    %25 = vector.broadcast %cst_16 : f32 to vector<1x128xf32>
    %26 = arith.addf %25, %24 : vector<1x128xf32>
    %27 = arith.divf %25, %26 : vector<1x128xf32>
    %c0_17 = arith.constant 0 : index
    %c0_18 = arith.constant 0 : index
    %28 = vector.load %arg11[%c0_17, %c0_18] : memref<1x128xf32, #tpu.memory_space<vmem>>, vector<1x128xf32>
    tpu.vector_store %arg11[%c0_17, %c0_18], %27 {strides = array<i32>} : memref<1x128xf32, #tpu.memory_space<vmem>>, vector<1x128xf32>,
    %cst_19 = arith.constant 1.000000e-07 : f32
    %cst_20 = arith.constant 0.99999988 : f32
    %29 = vector.broadcast %cst_19 : f32 to vector<1x128xf32>
    %30 = arith.maximumf %29, %27 : vector<1x128xf32>
    %31 = vector.broadcast %cst_20 : f32 to vector<1x128xf32>
    %32 = arith.minimumf %31, %30 : vector<1x128xf32>
    %cst_21 = arith.constant 1.000000e+00 : f32
    %33 = vector.broadcast %cst_21 : f32 to vector<1x128xf32>
    %34 = arith.subf %33, %32 : vector<1x128xf32>
    %c0_22 = arith.constant 0 : index
    %c0_23 = arith.constant 0 : index
    %35 = vector.load %arg10[%c0_22, %c0_23] : memref<1x128xf32, #tpu.memory_space<vmem>>, vector<1x128xf32>
    %c0_24 = arith.constant 0 : index
    %36 = memref.load %arg2[%c0_24] : memref<2xf32, #tpu.memory_space<smem>>
    %c1 = arith.constant 1 : index
    %37 = memref.load %arg2[%c1] : memref<2xf32, #tpu.memory_space<smem>>
    %38 = vector.broadcast %37 : f32 to vector<1x128xf32>
    %39 = arith.mulf %38, %35 : vector<1x128xf32>
    %40 = arith.mulf %39, %34 : vector<1x128xf32>
    %41 = arith.mulf %40, %34 : vector<1x128xf32>
    %42 = math.log %32 : vector<1x128xf32>
    %43 = arith.mulf %41, %42 : vector<1x128xf32>
    %cst_25 = arith.constant 1.000000e+00 : f32
    %44 = vector.broadcast %cst_25 : f32 to vector<1x128xf32>
    %45 = arith.subf %44, %35 : vector<1x128xf32>
    %46 = vector.broadcast %36 : f32 to vector<1x128xf32>
    %47 = arith.mulf %46, %45 : vector<1x128xf32>
    %48 = arith.mulf %47, %32 : vector<1x128xf32>
    %49 = arith.mulf %48, %32 : vector<1x128xf32>
    %50 = math.log %34 : vector<1x128xf32>
    %51 = arith.mulf %49, %50 : vector<1x128xf32>
    %52 = arith.addf %43, %51 : vector<1x128xf32>
    %cst_26 = arith.constant 0.000000e+00 : f32
    %53 = vector.broadcast %cst_26 : f32 to vector<1x128xf32>
    %54 = arith.subf %53, %52 : vector<1x128xf32>
    %55 = tpu.iota {dimensions = array<i32: 1>} : vector<1x128xi32>
    %c128_i32 = arith.constant 128 : i32
    %56 = arith.muli %arg0, %c128_i32 : i32
    %57 = vector.broadcast %56 : i32 to vector<1x128xi32>
    %58 = arith.addi %57, %55 : vector<1x128xi32>
    %c0_27 = arith.constant 0 : index
    %59 = memref.load %arg1[%c0_27] : memref<1xi32, #tpu.memory_space<smem>>
    %60 = vector.broadcast %59 : i32 to vector<1x128xi32>
    %61 = arith.cmpi slt, %58, %60 : vector<1x128xi32>
    %cst_28 = arith.constant 0.000000e+00 : f32
    %62 = vector.broadcast %cst_28 : f32 to vector<1x128xf32>
    %63 = arith.select %61, %54, %62 : vector<1x128xi1>, vector<1x128xf32>
    %c0_29 = arith.constant 0 : index
    %c0_30 = arith.constant 0 : index
    %64 = vector.load %arg12[%c0_29, %c0_30] : memref<1x128xf32, #tpu.memory_space<vmem>>, vector<1x128xf32>
    tpu.vector_store %arg12[%c0_29, %c0_30], %63 {strides = array<i32>} : memref<1x128xf32, #tpu.memory_space<vmem>>, vector<1x128xf32>,
    return
  }
  func.func @transform_0(%arg0: i32) -> i32 {
    %c0_i32 = arith.constant 0 : i32
    %c0_i32_0 = arith.constant 0 : i32
    return %c0_i32 : i32
  }
  func.func @transform_1(%arg0: i32) -> i32 {
    %c0_i32 = arith.constant 0 : i32
    %c0_i32_0 = arith.constant 0 : i32
    return %c0_i32 : i32
  }
  func.func @transform_2(%arg0: i32) -> i32 {
    %c0_i32 = arith.constant 0 : i32
    %c0_i32_0 = arith.constant 0 : i32
    return %c0_i32 : i32
  }
  func.func @transform_3(%arg0: i32) -> (i32, i32) {
    %c0_i32 = arith.constant 0 : i32
    %c0_i32_0 = arith.constant 0 : i32
    return %arg0, %c0_i32 : i32, i32
  }
  func.func @transform_4(%arg0: i32) -> (i32, i32) {
    %c0_i32 = arith.constant 0 : i32
    %c0_i32_0 = arith.constant 0 : i32
    %c0_i32_1 = arith.constant 0 : i32
    return %c0_i32, %c0_i32_0 : i32, i32
  }
  func.func @transform_5(%arg0: i32) -> (i32, i32) {
    %c0_i32 = arith.constant 0 : i32
    %c0_i32_0 = arith.constant 0 : i32
    %c0_i32_1 = arith.constant 0 : i32
    return %c0_i32, %c0_i32_0 : i32, i32
  }
  func.func @transform_6(%arg0: i32) -> (i32, i32) {
    %c0_i32 = arith.constant 0 : i32
    %c0_i32_0 = arith.constant 0 : i32
    %c0_i32_1 = arith.constant 0 : i32
    return %c0_i32, %c0_i32_0 : i32, i32
  }
  func.func @transform_7(%arg0: i32) -> (i32, i32) {
    %c0_i32 = arith.constant 0 : i32
    %c0_i32_0 = arith.constant 0 : i32
    %c0_i32_1 = arith.constant 0 : i32
    return %c0_i32, %c0_i32_0 : i32, i32
  }
  func.func @transform_8(%arg0: i32) -> (i32, i32) {
    %c0_i32 = arith.constant 0 : i32
    %c0_i32_0 = arith.constant 0 : i32
    %c0_i32_1 = arith.constant 0 : i32
    return %c0_i32, %c0_i32_0 : i32, i32
  }
  func.func @transform_9(%arg0: i32) -> (i32, i32) {
    %c0_i32 = arith.constant 0 : i32
    %c0_i32_0 = arith.constant 0 : i32
    return %c0_i32, %arg0 : i32, i32
  }
  func.func @transform_10(%arg0: i32) -> (i32, i32) {
    %c0_i32 = arith.constant 0 : i32
    %c0_i32_0 = arith.constant 0 : i32
    return %c0_i32, %arg0 : i32, i32
  }
  func.func @transform_11(%arg0: i32) -> (i32, i32) {
    %c0_i32 = arith.constant 0 : i32
    %c0_i32_0 = arith.constant 0 : i32
    return %c0_i32, %arg0 : i32, i32
  }
}

</mosaic_0001>

<bundles_post_ra>
// kernel: forward.1
= control target key start
LH: loop header
LB: loop body
LE: loop exit
PB: predicated region body
PF: predicated region fallthrough
CT: control target
= control target key end

     0   :  { %s1937_s0 = inlined_call_operand.<no memory space> [shape: s32[1], index: 0, kind: input, shape index: {}]   ;;  %s1938_s1 = inlined_call_operand.vmem [shape: f32[2], index: 1, kind: input, shape index: {}]   ;;  %s1939_s2 = inlined_call_operand.<no memory space> [shape: f32[1], index: 2, kind: input, shape index: {}]   ;;  %s1940_s3 = inlined_call_operand.vmem [shape: bf16[256,32], index: 3, kind: input, shape index: {}]   ;;  %s1941_s4 = inlined_call_operand.vmem [shape: bf16[128,32], index: 4, kind: input, shape index: {}]   ;;  %s1942_s5 = inlined_call_operand.vmem [shape: f32[128,1], index: 5, kind: input, shape index: {}]   ;;  %s1943_s6 = inlined_call_operand.vmem [shape: f32[64,128], index: 6, kind: input, shape index: {}]   ;;  %s1944_s7 = inlined_call_operand.vmem [shape: f32[64,1], index: 7, kind: input, shape index: {}]   ;;  %s1945_s8 = inlined_call_operand.vmem [shape: f32[64,1], index: 8, kind: input, shape index: {}]   ;;  %s1946_s9 = inlined_call_operand.vmem [shape: f32[1,256], index: 9, kind: input, shape index: {}]   ;;  %s1947_s10 = inlined_call_operand.hbm [shape: f32[1,256], index: 10, kind: output, shape index: {0}]   ;;  %s1948_s11 = inlined_call_operand.vmem [shape: f32[1,256], index: 11, kind: output, shape index: {1}]  }
   0x1   :  { %1949 = sst [smem:[#allocation10_spill]] %s1938_s1 }
   0x2   :  { %1950 = sst [smem:[#allocation11_spill]] %s1940_s3 }
   0x3   :  { %1951 = sst [smem:[#allocation12_spill]] %s1941_s4 }
   0x4   :  { %17 = sst [smem:[#allocation2]] %s1937_s0 }
   0x5   :  { %18 = sst [smem:[#allocation3]] %s1939_s2 }
   0x6   :  { %19 = vsyncpa [#allocation6], 0 }
   0x7   :  { %20 = vsyncpa [#allocation5], 0 }
   0x8   :  { %22 = vsyncpa [#allocation5 + $0x1], 0  ;;  %s1614_s21 = smov 0   ;;  %s1616_s22 = smov 0  }
   0x9   :  { %s1618_s23 = smov 0   ;;  %s1620_s24 = smov 0  }
   0xa LB: > { %s1635_s0 = sadd.s32 4294967295, %s1543_s24   ;;  %s1191_s2 = sadd.s32 4294967294, %s1543_s24   ;;  %s1543_s24 = sphi %s1620_s24, %s1961_s24   ;;  %s1539_s23 = sphi %s1618_s23, %s1960_s23   ;;  %s1535_s22 = sphi %s1616_s22, %s1959_s22   ;;  %s1531_s21 = sphi %s1614_s21, %s1958_s21  }
   0xb   : > { %s1639_s25 = sadd.s32 1, %s1543_s24   ;;  %s255_s26 = sadd.s32 1, %s1539_s23 }
   0xc   : > { %s252_s27 = ssub.s32 %s1543_s24, %s1639_s25  ;;  %p265_p0 = scmp.ne.s32.totalorder %s1539_s23, %s1535_s22 }
   0xd   : > { %p253_p1 = scmp.eq.s32.totalorder %s252_s27, 0  ;;  %p266_p2 = scmp.eq.s32.totalorder %s1635_s0, 1 }
   0xe   : > { %p271_p3 = scmp.ne.s32.totalorder %s1535_s22, %s1531_s21  ;;  %p272_p4 = scmp.eq.s32.totalorder %s1191_s2, 1 }
   0xf   : > { %s1650_s28 = scalar_select %p253_p1, %s1539_s23, %s255_s26  }
  0x10   : > { %p1652_p5 = por %p266_p2, %p265_p0  ;;  %p1656_p6 = por %p272_p4, %p271_p3 }
  0x11   : > { %p1192_p7 = scmp.ge.s32.totalorder %s1543_s24, 1  ;;  %p305_p8 = scmp.lt.s32.totalorder %s1543_s24, 3 }
  0x12   : > { %p1399_p9 = scmp.eq.s32.totalorder %s1635_s0, 0  ;;  %s1955_s1 = sld [smem:[#allocation10_spill]] }
  0x13   : > { %p1663_p10 = pnand %p1192_p7, %p305_p8 }
  0x15   : > { %p1391_p11 = pneg %p1663_p10 }
  0x17   : > { %p1392_p12 = pnand %p1399_p9, %p1391_p11 }
  0x18   : > { %s321_s15 = sshll.u32 %s1955_s1, 4  ;;  %s322_s15 = int_to_ptr.vmem [resolvable:$true] %s321_s15 }
  0x19   : > { %s1462_s16 = scalar_lea.vmem %s322_s15, 16  ;;  %p1464_p0 = pneg %p1392_p12 }
  0x1a   : > { %p1463_p13 = scmp.ne.s32.totalorder %s322_s15, %s1462_s16  ;;  %p1470_p3 = scmp.lt.s32.totalorder %s322_s15, %s322_s15 }
  0x1b   : > { %p1471_p4 = scmp.lt.s32.totalorder %s1462_s16, %s1462_s16 }
  0x1c   : > { %p1465_p1 = pnand %p1464_p0, %p1463_p13 }
  0x1d   : > { %p1472_p7 = por %p1471_p4, %p1470_p3 }
  0x1e   : > { %p1466_p2 = pneg %p1465_p1 }
  0x20   : > { %p1473_p8 = pnand %p1472_p7, %p1466_p2 }
  0x22   : > { %1476 = shalt.err (!%p1473_p8)
}
  0x23   : > { %s1545_s17 = smov [#allocation4]   ;;  %367 = sbr.rel (%p1663_p10) target bundleno = 684 (0x2ac), region = 60 }
  0x24   : > { %1394 = dma.vmem_to_smem (!%p1392_p12), %s322_s15, 16, %s1545_s17, [#allocation6]  }
  0x2a   : > { %1522 = dma.done.wait (%p1399_p9), [#allocation6], 16  }
  0x2b   : > { %1524 = vsyncadd (%p1399_p9), [#allocation6], 4294967280 }
  0x2c   : > { %373 = sfence }
  0x2d   : > { %s1681_s18 = sshll.u32 %s1635_s0, 4  ;;  %s1956_s4 = sld [smem:[#allocation12_spill]]  ;;  %vm634_vm0 = vcmask 261120   ;;  %v1546_v1 = vmov 0   ;;  %v458_v2 = vld [vmem:[%s1942_s5] sm:$0xff]  ;;  %v460_v8 = vld [vmem:[%s1942_s5 + $0x10] sm:$0xff] }
  0x2e   : > { %p414_p11 = scmp.lt.s32.totalorder %s1681_s18, 31  ;;  %1436 = vset.pattern.permute.xlu0 %v1546_v1  ;;  %1437 = vset.pattern.permute.xlu1 %v1546_v1  ;;  %s1957_s3 = sld [smem:[#allocation11_spill]]  ;;  %v459_v9 = vld [vmem:[%s1942_s5 + $0x8] sm:$0xff]  ;;  %v461_v10 = vld [vmem:[%s1942_s5 + $0x18] sm:$0xff]  ;;  %v462_v11 = vld [vmem:[%s1942_s5 + $0x20] sm:$0xff] }
  0x2f   : > { %476 = vperm.xlu0 %1436, %v458_v2   ;;  %486 = vperm.xlu1 %1437, %v460_v8   ;;  %v463_v12 = vld [vmem:[%s1942_s5 + $0x28] sm:$0xff]  ;;  %v464_v15 = vld [vmem:[%s1942_s5 + $0x30] sm:$0xff]  ;;  %v465_v16 = vld [vmem:[%s1942_s5 + $0x38] sm:$0xff]  ;;  %s406_s14 = sand.u32 1, %s1535_s22   ;;  %p419_p9 = scmp.lt.s32.totalorder %s1635_s0, 1 }
  0x30   : > { %s415_s2 = scalar_select %p414_p11, %s1681_s18, 31  ;;  %v466_v17 = vld [vmem:[%s1942_s5 + $0x40] sm:$0xff]  ;;  %v467_v18 = vld [vmem:[%s1942_s5 + $0x48] sm:$0xff]  ;;  %v468_v21 = vld [vmem:[%s1942_s5 + $0x50] sm:$0xff] }
  0x31   : > { %v469_v22 = vld [vmem:[%s1942_s5 + $0x58] sm:$0xff]  ;;  %v470_v23 = vld [vmem:[%s1942_s5 + $0x60] sm:$0xff]  ;;  %v471_v24 = vld [vmem:[%s1942_s5 + $0x68] sm:$0xff]  ;;  %s1869_s15 = scalar_select %p419_p9, %s1635_s0, 1 }
  0x32   : > { %s1198_s26 = sshll.u32 %s415_s2, 2  ;;  %v472_v27 = vld [vmem:[%s1942_s5 + $0x70] sm:$0xff]  ;;  %v473_v28 = vld [vmem:[%s1942_s5 + $0x78] sm:$0xff]  ;;  %v804_v29 = vld [vmem:[%s1944_s7] sm:$0xff]  ;;  %s407_s16 = scalar_lea.vmem [#allocation7], %s406_s14 }
  0x33   : > { %v1446_v0 = vld [vmem:[%s1956_s4] sm:$0xff]   ;;  %481 = vperm.xlu0 %1436, %v459_v9   ;;  %491 = vperm.xlu1 %1437, %v461_v10   ;;  %v805_v30 = vld [vmem:[%s1944_s7 + $0x8] sm:$0xff]  ;;  %v806_v33 = vld [vmem:[%s1944_s7 + $0x10] sm:$0xff]  ;;  %s1093_s17 = sshll.u32 %s407_s16, 4  ;;  %s1871_s19 = sld [smem:[#allocation4]]  ;;  %s1881_s17 = int_to_ptr.vmem [resolvable:$true] %s1093_s17 }
  0x34   : > { %1285 = vmatprep.mubr.msk.bf16.mxu0 %vm634_vm0, %v1446_v0  ;;  %s1692_s13 = scalar_lea.vmem %s1957_s3, %s1198_s26  ;;  %v807_v34 = vld [vmem:[%s1944_s7 + $0x18] sm:$0xff]  ;;  %v965_v35 = vld [vmem:[%s1945_s8] sm:$0xff]  ;;  %v966_v36 = vld [vmem:[%s1945_s8 + $0x8] sm:$0xff]  ;;  %s1873_s20 = sld [smem:[#allocation4 + $0x1]] }
  0x35   : > { %v1438_v3 = vld [vmem:[%s1692_s13] sm:$0xff]   ;;  %v1439_v4 = vld [vmem:[%s1692_s13 + $0x8] sm:$0xff]   ;;  %v1440_v7 = vld [vmem:[%s1692_s13 + $0x10] sm:$0xff]   ;;  %s1879_s27 = scalar_lea.hbm %s1947_s10, %s1681_s18  ;;  %s421_s1 = scalar_lea.vmem %s1946_s9, %s1869_s15 }
  0x36   : > { %1377 = vmatprep.subr.msk.bf16.mxu0 %vm634_vm0, %v1438_v3  ;;  %v660_v5 = vsel %vm634_vm0, %v1438_v3, 0  ;;  %v663_v6 = vsel %vm634_vm0, %v1439_v4, 0  ;;  %v666_v13 = vsel %vm634_vm0, %v1440_v7, 0  ;;  %v1441_v14 = vld [vmem:[%s1692_s13 + $0x18] sm:$0xff]   ;;  %v1442_v20 = vld [vmem:[%s1692_s13 + $0x20] sm:$0xff]   ;;  %v1443_v26 = vld [vmem:[%s1692_s13 + $0x28] sm:$0xff]  }
  0x37   : > { %1270 = vmatpush3.bf16.xpose.msra.mxu0 %v660_v5  ;;  %496 = vperm.xlu0 %1436, %v462_v11   ;;  %v669_v19 = vsel %vm634_vm0, %v1441_v14, 0  ;;  %v672_v25 = vsel %vm634_vm0, %v1442_v20, 0  ;;  %v675_v31 = vsel %vm634_vm0, %v1443_v26, 0  ;;  %v1444_v32 = vld [vmem:[%s1692_s13 + $0x30] sm:$0xff]   ;;  %v1445_v38 = vld [vmem:[%s1692_s13 + $0x38] sm:$0xff]   ;;  %v808_v39 = vld [vmem:[%s1944_s7 + $0x20] sm:$0xff] }
  0x38   : > { %1378 = vmatprep.subr.msk.bf16.mxu0 %vm634_vm0, %v1439_v4  ;;  %501 = vperm.xlu1 %1437, %v463_v12   ;;  %v678_v37 = vsel %vm634_vm0, %v1444_v32, 0  ;;  %v967_v40 = vld [vmem:[%s1945_s8 + $0x10] sm:$0xff]  ;;  %v809_v41 = vld [vmem:[%s1944_s7 + $0x28] sm:$0xff]  ;;  %v968_v42 = vld [vmem:[%s1945_s8 + $0x18] sm:$0xff]  ;;  %v681_v43 = vsel %vm634_vm0, %v1445_v38, 0  ;;  %s1034_s13 = sld [smem:[#allocation3]] }
  0x39   : > { %v810_v44 = vld [vmem:[%s1944_s7 + $0x30] sm:$0xff]  ;;  %v969_v45 = vld [vmem:[%s1945_s8 + $0x20] sm:$0xff]  ;;  %v811_v46 = vld [vmem:[%s1944_s7 + $0x38] sm:$0xff]  ;;  %s1078_s3 = scalar_lea.sflag [#allocation5], %s406_s14  ;;  %s1547_s18 = smov [#allocation7]  }
  0x3a   : > { %v1447_v47 = vld [vmem:[%s1956_s4 + $0x8] sm:$0xff]   ;;  %v1448_v48 = vld [vmem:[%s1956_s4 + $0x10] sm:$0xff]   ;;  %v972_v51 = vld [vmem:[%s1945_s8 + $0x38] sm:$0xff]  ;;  %s1481_s2 = sshll.u32 %s1547_s18, 4  ;;  %s1482_s2 = int_to_ptr.vmem [resolvable:$false] %s1481_s2 }
  0x3b   : > { %506 = vperm.xlu0 %1436, %v464_v15   ;;  %v970_v49 = vld [vmem:[%s1945_s8 + $0x28] sm:$0xff]  ;;  %v971_v50 = vld [vmem:[%s1945_s8 + $0x30] sm:$0xff]  ;;  %v1449_v52 = vld [vmem:[%s1956_s4 + $0x18] sm:$0xff]   ;;  %s1483_s26 = scalar_lea.vmem %s1482_s2, 32  ;;  %p1484_p0 = scmp.lt.s32.totalorder %s1881_s17, %s1482_s2 }
  0x3c   : > { %511 = vperm.xlu1 %1437, %v465_v16   ;;  %v1450_v53 = vld [vmem:[%s1956_s4 + $0x20] sm:$0xff]   ;;  %v1451_v54 = vld [vmem:[%s1956_s4 + $0x28] sm:$0xff]   ;;  %v1452_v55 = vld [vmem:[%s1956_s4 + $0x30] sm:$0xff]  }
  0x3d   : > { %v1453_v56 = vld [vmem:[%s1956_s4 + $0x38] sm:$0xff]   ;;  %v796_v57 = vld [vmem:[%s1943_s6] sm:$0xff]  ;;  %s1477_s4 = scalar_lea.vmem %s1881_s17, 16 }
  0x3e   : > { %1333 = vmatprep.mubr.f32.mxu1 %v796_v57  ;;  %p1478_p10 = scmp.ne.s32.totalorder %s1881_s17, %s1477_s4  ;;  %p1485_p1 = scmp.lt.s32.totalorder %s1483_s26, %s1477_s4 }
  0x3f   : > { %1272 = vmatpush3.bf16.xpose.msra.mxu0 %v663_v6  ;;  %516 = vperm.xlu0 %1436, %v466_v17  }
  0x40   : > { %1379 = vmatprep.subr.msk.bf16.mxu0 %vm634_vm0, %v1440_v7  ;;  %521 = vperm.xlu1 %1437, %v467_v18   ;;  %p1479_p12 = pnand %p1478_p10, %p1652_p5  ;;  %p1486_p2 = por %p1485_p1, %p1484_p0 }
  0x42   : > { %p1480_p13 = pneg %p1479_p12 }
  0x43   : > { %526 = vperm.xlu0 %1436, %v468_v21  }
  0x44   : > { %531 = vperm.xlu1 %1437, %v469_v22   ;;  %p1487_p3 = pnand %p1486_p2, %p1480_p13 }
  0x47   : > { %1274 = vmatpush3.bf16.xpose.msra.mxu0 %v666_v13  ;;  %536 = vperm.xlu0 %1436, %v470_v23  }
  0x48   : > { %1380 = vmatprep.subr.msk.bf16.mxu0 %vm634_vm0, %v1441_v14  ;;  %541 = vperm.xlu1 %1437, %v471_v24  }
  0x4b   : > { %546 = vperm.xlu0 %1436, %v472_v27  }
  0x4c   : > { %551 = vperm.xlu1 %1437, %v473_v28  }
  0x4f   : > { %1276 = vmatpush3.bf16.xpose.msra.mxu0 %v669_v19  ;;  %814 = vperm.xlu0 %1436, %v804_v29  }
  0x50   : > { %1381 = vmatprep.subr.msk.bf16.mxu0 %vm634_vm0, %v1442_v20  ;;  %819 = vperm.xlu1 %1437, %v805_v30  }
  0x53   : > { %824 = vperm.xlu0 %1436, %v806_v33  }
  0x54   : > { %829 = vperm.xlu1 %1437, %v807_v34  }
  0x57   : > { %1278 = vmatpush3.bf16.xpose.msra.mxu0 %v672_v25  ;;  %975 = vperm.xlu0 %1436, %v965_v35  }
  0x58   : > { %1382 = vmatprep.subr.msk.bf16.mxu0 %vm634_vm0, %v1443_v26  ;;  %980 = vperm.xlu1 %1437, %v966_v36  }
  0x5b   : > { %834 = vperm.xlu0 %1436, %v808_v39  }
  0x5c   : > { %985 = vperm.xlu1 %1437, %v967_v40  }
  0x5f   : > { %1280 = vmatpush3.bf16.xpose.msra.mxu0 %v675_v31  ;;  %839 = vperm.xlu0 %1436, %v809_v41  }
  0x60   : > { %1383 = vmatprep.subr.msk.bf16.mxu0 %vm634_vm0, %v1444_v32  ;;  %990 = vperm.xlu1 %1437, %v968_v42  }
  0x63   : > { %844 = vperm.xlu0 %1436, %v810_v44  }
  0x64   : > { %995 = vperm.xlu1 %1437, %v969_v45  }
  0x67   : > { %1282 = vmatpush3.bf16.xpose.msra.mxu0 %v678_v37  ;;  %849 = vperm.xlu0 %1436, %v811_v46  }
  0x68   : > { %1384 = vmatprep.subr.msk.bf16.mxu0 %vm634_vm0, %v1445_v38  ;;  %1000 = vperm.xlu1 %1437, %v970_v49  }
  0x6b   : > { %1005 = vperm.xlu0 %1436, %v971_v50  }
  0x6c   : > { %1010 = vperm.xlu1 %1437, %v972_v51  }
  0x6f   : > { %1284 = vmatpush3.bf16.xpose.msra.mxu0 %v681_v43 }
  0x76   : > { %1286 = vmatmul.mubr.msk.bf16.vlgmr.msra.gmra.mrb[0].mxu0 %vm634_vm0, %v1447_v47 }
  0x77   : > { %1289 = vmatprep.mubr.msk.bf16.mxu0 %vm634_vm0, %v1448_v48 }
  0x7e   : > { %1290 = vmatmul.mubr.msk.bf16.gmra.mrb[4].mxu0 %vm634_vm0, %v1449_v52 }
  0x7f   : > { %1293 = vmatprep.mubr.msk.bf16.mxu0 %vm634_vm0, %v1450_v53 }
  0x86   : > { %1294 = vmatmul.mubr.msk.bf16.gmra.mrb[8].mxu0 %vm634_vm0, %v1451_v54 }
  0x87   : > { %1297 = vmatprep.mubr.msk.bf16.mxu0 %vm634_vm0, %v1452_v55 }
  0x8e   : > { %1298 = vmatmul.mubr.msk.bf16.gmra.mrb[12].mxu0 %vm634_vm0, %v1453_v56 }
  0xae   : > { %v477_v58 = vpop.permute.xlu0 %476  ;;  %v487_v59 = vpop.permute.xlu1 %486 }
  0xb2   : > { %v482_v60 = vpop.permute.xlu0 %481  ;;  %v492_v61 = vpop.permute.xlu1 %491 }
  0xb6   : > { %v497_v62 = vpop.permute.xlu0 %496 }
  0xb7   : > { %v502_v63 = vpop.permute.xlu1 %501 }
  0xba   : > { %v507_v0 = vpop.permute.xlu0 %506 }
  0xbb   : > { %v512_v4 = vpop.permute.xlu1 %511 }
  0xbe   : > { %v517_v12 = vpop.permute.xlu0 %516 }
  0xbf   : > { %v522_v16 = vpop.permute.xlu1 %521 }
  0xc2   : > { %v527_v25 = vpop.permute.xlu0 %526 }
  0xc3   : > { %v532_v29 = vpop.permute.xlu1 %531 }
  0xc6   : > { %v537_v37 = vpop.permute.xlu0 %536 }
  0xc7   : > { %v542_v42 = vpop.permute.xlu1 %541 }
  0xca   : > { %v547_v49 = vpop.permute.xlu0 %546 }
  0xcb   : > { %v552_v54 = vpop.permute.xlu1 %551 }
 0x149   : > { %v1287_v1 = vpop.f32.mrb[0].mxu0 }
 0x14a   : > { %v726_v2 = vadd.f32 %v1287_v1, %v487_v59  ;;  %v717_v3 = vpop.f32.mrb[1].mxu0 }
 0x14b   : > { %v718_v5 = vadd.f32 %v717_v3, %v477_v58  ;;  %v1288_v6 = vpop.f32.mrb[2].mxu0  ;;  %v798_v3 = vld [vmem:[%s1943_s6 + $0x10] sm:$0xff] }
 0x14c   : > { %v729_v7 = vadd.f32 %v1288_v6, %v492_v61  ;;  %v720_v8 = vpop.f32.mrb[3].mxu0  ;;  %v782_v10 = vmax.f32 %v726_v2, 0.0  ;;  %v797_v2 = vld [vmem:[%s1943_s6 + $0x8] sm:$0xff] }
 0x14d   : > { %v721_v9 = vadd.f32 %v720_v8, %v482_v60  ;;  %v780_v13 = vmax.f32 %v718_v5, 0.0  ;;  %v800_v5 = vld [vmem:[%s1943_s6 + $0x20] sm:$0xff]  ;;  %v801_v6 = vld [vmem:[%s1943_s6 + $0x28] sm:$0xff]  ;;  %v803_v8 = vld [vmem:[%s1943_s6 + $0x38] sm:$0xff] }
 0x14e   : > { %v783_v11 = vmax.f32 %v729_v7, 0.0  ;;  %v802_v7 = vld [vmem:[%s1943_s6 + $0x30] sm:$0xff] }
 0x14f   : > { %v781_v14 = vmax.f32 %v721_v9, 0.0  ;;  %v815_v9 = vpop.permute.xlu0 %814 }
 0x150   : > { %v1349_v15 = vpack.c.bf16 %v783_v11, %v782_v10  ;;  %v820_v10 = vpop.permute.xlu1 %819 }
 0x151   : > { %v1291_v17 = vpop.f32.mrb[4].mxu0  ;;  %v1345_v18 = vpack.c.bf16 %v781_v14, %v780_v13 }
 0x152   : > { %v742_v19 = vadd.f32 %v1291_v17, %v507_v0  ;;  %v733_v20 = vpop.f32.mrb[5].mxu0 }
 0x153   : > { %v734_v21 = vadd.f32 %v733_v20, %v497_v62  ;;  %v1292_v22 = vpop.f32.mrb[6].mxu0  ;;  %1346 = vmatprep.subr.bf16.mxu1 %v1345_v18  ;;  %v825_v11 = vpop.permute.xlu0 %824 }
 0x154   : > { %v745_v23 = vadd.f32 %v1292_v22, %v512_v4  ;;  %v736_v24 = vpop.f32.mrb[7].mxu0  ;;  %1348 = vmatpush3.bf16.msra.mxu1 %v1345_v18  ;;  %v786_v27 = vmax.f32 %v742_v19, 0.0  ;;  %v799_v4 = vld [vmem:[%s1943_s6 + $0x18] sm:$0xff] }
 0x155   : > { %v737_v26 = vadd.f32 %v736_v24, %v502_v63  ;;  %1350 = vmatprep.subr.bf16.mxu1 %v1349_v15  ;;  %v784_v30 = vmax.f32 %v734_v21, 0.0 }
 0x156   : > { %v787_v28 = vmax.f32 %v745_v23, 0.0 }
 0x157   : > { %v785_v31 = vmax.f32 %v737_v26, 0.0  ;;  %v976_v13 = vpop.permute.xlu0 %975 }
 0x158   : > { %v1357_v32 = vpack.c.bf16 %v787_v28, %v786_v27  ;;  %1352 = vmatpush3.bf16.msra.mxu1 %v1349_v15 }
 0x159   : > { %v1353_v33 = vpack.c.bf16 %v785_v31, %v784_v30  ;;  %v1295_v34 = vpop.f32.mrb[8].mxu0 }
 0x15a   : > { %v758_v35 = vadd.f32 %v1295_v34, %v527_v25  ;;  %v749_v36 = vpop.f32.mrb[9].mxu0 }
 0x15b   : > { %v750_v38 = vadd.f32 %v749_v36, %v517_v12  ;;  %v1296_v39 = vpop.f32.mrb[10].mxu0  ;;  %1354 = vmatprep.subr.bf16.mxu1 %v1353_v33  ;;  %v830_v12 = vpop.permute.xlu1 %829 }
 0x15c   : > { %v761_v40 = vadd.f32 %v1296_v39, %v532_v29  ;;  %v752_v41 = vpop.f32.mrb[11].mxu0  ;;  %1356 = vmatpush3.bf16.msra.mxu1 %v1353_v33  ;;  %v790_v44 = vmax.f32 %v758_v35, 0.0  ;;  %v835_v15 = vpop.permute.xlu0 %834 }
 0x15d   : > { %v753_v43 = vadd.f32 %v752_v41, %v522_v16  ;;  %1358 = vmatprep.subr.bf16.mxu1 %v1357_v32  ;;  %v788_v46 = vmax.f32 %v750_v38, 0.0 }
 0x15e   : > { %v791_v45 = vmax.f32 %v761_v40, 0.0 }
 0x15f   : > { %v789_v47 = vmax.f32 %v753_v43, 0.0  ;;  %v981_v14 = vpop.permute.xlu1 %980 }
 0x160   : > { %v1365_v48 = vpack.c.bf16 %v791_v45, %v790_v44  ;;  %1360 = vmatpush3.bf16.msra.mxu1 %v1357_v32  ;;  %v840_v17 = vpop.permute.xlu0 %839 }
 0x161   : > { %v1361_v50 = vpack.c.bf16 %v789_v47, %v788_v46  ;;  %v1299_v51 = vpop.f32.mrb[12].mxu0 }
 0x162   : > { %v774_v52 = vadd.f32 %v1299_v51, %v547_v49  ;;  %v765_v53 = vpop.f32.mrb[13].mxu0 }
 0x163   : > { %v766_v55 = vadd.f32 %v765_v53, %v537_v37  ;;  %v1300_v56 = vpop.f32.mrb[14].mxu0  ;;  %1362 = vmatprep.subr.bf16.mxu1 %v1361_v50  ;;  %v986_v16 = vpop.permute.xlu1 %985 }
 0x164   : > { %v777_v57 = vadd.f32 %v1300_v56, %v552_v54  ;;  %v768_v58 = vpop.f32.mrb[15].mxu0  ;;  %1364 = vmatpush3.bf16.msra.mxu1 %v1361_v50  ;;  %v794_v60 = vmax.f32 %v774_v52, 0.0  ;;  %v845_v26 = vpop.permute.xlu0 %844 }
 0x165   : > { %v769_v59 = vadd.f32 %v768_v58, %v542_v42  ;;  %1366 = vmatprep.subr.bf16.mxu1 %v1365_v48  ;;  %v792_v62 = vmax.f32 %v766_v55, 0.0 }
 0x166   : > { %v795_v61 = vmax.f32 %v777_v57, 0.0 }
 0x167   : > { %v793_v63 = vmax.f32 %v769_v59, 0.0  ;;  %v991_v19 = vpop.permute.xlu1 %990 }
 0x168   : > { %v1373_v0 = vpack.c.bf16 %v795_v61, %v794_v60  ;;  %1368 = vmatpush3.bf16.msra.mxu1 %v1365_v48  ;;  %v850_v41 = vpop.permute.xlu0 %849 }
 0x169   : > { %v1369_v1 = vpack.c.bf16 %v793_v63, %v792_v62 }
 0x16b   : > { %1370 = vmatprep.subr.bf16.mxu1 %v1369_v1  ;;  %v996_v32 = vpop.permute.xlu1 %995 }
 0x16c   : > { %1372 = vmatpush3.bf16.msra.mxu1 %v1369_v1  ;;  %v1006_v57 = vpop.permute.xlu0 %1005 }
 0x16d   : > { %1374 = vmatprep.subr.bf16.mxu1 %v1373_v0 }
 0x16f   : > { %v1001_v47 = vpop.permute.xlu1 %1000 }
 0x170   : > { %1376 = vmatpush3.bf16.msra.mxu1 %v1373_v0 }
 0x173   : > { %1334 = vmatmul.mubr.f32.vlgmr.msra.gmra.mrb[0].mxu1 %v797_v2  ;;  %v1011_v60 = vpop.permute.xlu1 %1010 }
 0x174   : > { %1336 = vmatprep.mubr.f32.mxu1 %v798_v3 }
 0x177   : > { %1337 = vmatmul.mubr.f32.gmra.mrb[2].mxu1 %v799_v4 }
 0x178   : > { %1339 = vmatprep.mubr.f32.mxu1 %v800_v5  ;;  %v1035_v5 = vstv %s1034_s13 }
 0x17b   : > { %1340 = vmatmul.mubr.f32.gmra.mrb[4].mxu1 %v801_v6 }
 0x17c   : > { %1342 = vmatprep.mubr.f32.mxu1 %v802_v7 }
 0x17f   : > { %1343 = vmatmul.mubr.f32.gmra.mrb[6].mxu1 %v803_v8 }
 0x246   : > { %v1335_v18 = vpop.f32.mrb[0].mxu1 }
 0x247   : > { %v924_v20 = vadd.f32 %v1335_v18, %v820_v10  ;;  %v918_v21 = vpop.f32.mrb[1].mxu1 }
 0x248   : > { %v919_v22 = vadd.f32 %v918_v21, %v815_v9 }
 0x249   : > { %v958_v23 = vmax.f32 %v924_v20, 0.0 }
 0x24a   : > { %v957_v24 = vmax.f32 %v919_v22, 0.0  ;;  %v1338_v25 = vpop.f32.mrb[2].mxu1 }
 0x24b   : > { %v1014_v27 = vmul.f32 %v981_v14, %v958_v23  ;;  %v934_v28 = vadd.f32 %v1338_v25, %v830_v12  ;;  %v928_v29 = vpop.f32.mrb[3].mxu1 }
 0x24c   : > { %v1013_v30 = vmul.f32 %v976_v13, %v957_v24  ;;  %v929_v31 = vadd.f32 %v928_v29, %v825_v11 }
 0x24d   : > { %v960_v34 = vmax.f32 %v934_v28, 0.0 }
 0x24e   : > { %v1021_v33 = vadd.f32 %v1014_v27, %v1013_v30  ;;  %v959_v35 = vmax.f32 %v929_v31, 0.0  ;;  %v1341_v36 = vpop.f32.mrb[4].mxu1 }
 0x24f   : > { %v944_v37 = vadd.f32 %v1341_v36, %v840_v17  ;;  %v938_v38 = vpop.f32.mrb[5].mxu1  ;;  %v1016_v42 = vmul.f32 %v991_v19, %v960_v34 }
 0x250   : > { %v1015_v39 = vmul.f32 %v986_v16, %v959_v35  ;;  %v939_v40 = vadd.f32 %v938_v38, %v835_v15 }
 0x251   : > { %v962_v44 = vmax.f32 %v944_v37, 0.0 }
 0x252   : > { %v1022_v43 = vadd.f32 %v1021_v33, %v1015_v39  ;;  %v961_v45 = vmax.f32 %v939_v40, 0.0  ;;  %v1344_v46 = vpop.f32.mrb[6].mxu1 }
 0x253   : > { %v954_v48 = vadd.f32 %v1344_v46, %v850_v41  ;;  %v948_v49 = vpop.f32.mrb[7].mxu1  ;;  %v1018_v53 = vmul.f32 %v1001_v47, %v962_v44 }
 0x254   : > { %v1017_v50 = vmul.f32 %v996_v32, %v961_v45  ;;  %v1023_v51 = vadd.f32 %v1022_v43, %v1016_v42  ;;  %v949_v52 = vadd.f32 %v948_v49, %v845_v26 }
 0x255   : > { %v964_v55 = vmax.f32 %v954_v48, 0.0 }
 0x256   : > { %v1024_v54 = vadd.f32 %v1023_v51, %v1017_v50  ;;  %v963_v56 = vmax.f32 %v949_v52, 0.0 }
 0x257   : > { %v1020_v61 = vmul.f32 %v1011_v60, %v964_v55 }
 0x258   : > { %v1019_v58 = vmul.f32 %v1006_v57, %v963_v56  ;;  %v1025_v59 = vadd.f32 %v1024_v54, %v1018_v53 }
 0x25a   : > { %v1026_v62 = vadd.f32 %v1025_v59, %v1019_v58 }
 0x25c   : > { %v1027_v63 = vadd.f32 %v1026_v62, %v1020_v61 }
 0x25e   : > { %v1028_v0 = vrot.slane %v1027_v63, 4 }
 0x260   : > { %v1029_v1 = vadd.f32 %v1028_v0, %v1027_v63 }
 0x262   : > { %v1030_v2 = vrot.slane %v1029_v1, 2 }
 0x264   : > { %v1031_v3 = vadd.f32 %v1030_v2, %v1029_v1 }
 0x266   : > { %v1032_v4 = vrot.slane %v1031_v3, 1 }
 0x268   : > { %v1033_v6 = vadd.f32 %v1032_v4, %v1031_v3 }
 0x26a   : > { %v1036_v7 = vadd.f32 %v1035_v5, %v1033_v6 }
 0x26c   : > { %v1223_v8 = vmul.f32 -1.442695, %v1036_v7 }
 0x26e   : > { %1454 = vpow2.f32 %v1223_v8 }
 0x278   : > { %v1455_v9 = vpop.eup %1454 }
 0x279   : > { %v1040_v10 = vadd.f32 1.0, %v1455_v9 }
 0x27b   : > { %1456 = vrcp.f32 %v1040_v10 }
 0x285   : > { %v1457_v11 = vpop.eup %1456 }
 0x286   : > { %1043 = vst [vmem:[%s407_s16] sm:$0x1] %v1457_v11  ;;  %v1044_v12 = vmax.f32 %v1457_v11, 1e-07 }
 0x287   : > { %1490 = shalt.err (!%p1487_p3)
}
 0x288   : > { %s1491_s14 = scalar_lea.hbm %s1879_s27, 16  ;;  %s1495_s13 = scalar_lea.hbm %s1947_s10, 32 }
 0x289   : > { %p1492_p4 = scmp.ne.s32.totalorder %s1879_s27, %s1491_s14  ;;  %p1496_p11 = scmp.lt.u32.totalorder %s1879_s27, %s1947_s10 }
 0x28a   : > { %p1497_p9 = scmp.lt.u32.totalorder %s1495_s13, %s1491_s14  ;;  %p1499_p12 = scmp.lt.u32.totalorder %s1491_s14, %s1879_s27 }
 0x28b   : > { %p1493_p7 = pnand %p1492_p4, %p1652_p5 }
 0x28c   : > { %p1498_p10 = por %p1497_p9, %p1496_p11 }
 0x28d   : > { %p1494_p8 = pneg %p1493_p7 }
 0x28e   : > { %p1500_p13 = por %p1499_p12, %p1498_p10 }
 0x290   : > { %p1501_p0 = pnand %p1500_p13, %p1494_p8 }
 0x292   : > { %1504 = shalt.err (!%p1501_p0)
}
 0x293   : > { %1389 = dma.vmem_to_hbm [thread:$0]  (%p1652_p5), %s1881_s17, 16, %s1879_s27, %s1078_s3   ;;  %v1045_v13 = vmin.f32 %v1044_v12, 0.9999999  ;;  %v1047_v14 = vld [vmem:[%s421_s1] sm:$0x1]  ;;  %v1050_v17 = vstv %s1873_s20  ;;  %v1058_v18 = vstv %s1871_s19  ;;  %v1067_v21 = vlaneseq }
 0x294   : > { %v1057_v16 = vsub.f32 1.0, %v1047_v14  ;;  %v1051_v19 = vmul.f32 %v1050_v17, %v1047_v14  ;;  %s1072_s29 = sld [smem:[#allocation2]]  ;;  %s1225_s14 = sshll.u32 %s1635_s0, 7 }
 0x295   : > { %v1046_v15 = vsub.f32 1.0, %v1045_v13  ;;  %1458 = vlog2.f32 %v1045_v13  ;;  %v1068_v25 = vand.u32 127, %v1067_v21  ;;  %v1070_v27 = vstv %s1225_s14  ;;  %s424_s0 = scalar_lea.vmem %s1948_s11, %s1869_s15 }
 0x296   : > { %v1059_v20 = vmul.f32 %v1058_v18, %v1057_v16 }
 0x297   : > { %1460 = vlog2.f32 %v1046_v15  ;;  %v1052_v22 = vmul.f32 %v1051_v19, %v1046_v15  ;;  %v1071_v32 = vadd.s32 %v1070_v27, %v1068_v25 }
 0x298   : > { %v1060_v23 = vmul.f32 %v1059_v20, %v1045_v13 }
 0x299   : > { %v1053_v29 = vmul.f32 %v1052_v22, %v1046_v15 }
 0x29a   : > { %v1061_v30 = vmul.f32 %v1060_v23, %v1045_v13  ;;  %v1073_v35 = vstv %s1072_s29 }
 0x29b   : > { %vm1074_vm1 = vcmp.lt.s32.totalorder %v1071_v32, %v1073_v35 }
 0x29f   : > { %v1459_v24 = vpop.eup %1458 }
 0x2a0   : > { %v1055_v26 = vmul.f32 0.6931472, %v1459_v24 }
 0x2a1   : > { %v1461_v28 = vpop.eup %1460 }
 0x2a2   : > { %v1063_v31 = vmul.f32 0.6931472, %v1461_v28  ;;  %v1056_v33 = vmul.f32 %v1055_v26, %v1053_v29 }
 0x2a4   : > { %v1064_v34 = vmul.f32 %v1063_v31, %v1061_v30 }
 0x2a6   : > { %v1065_v36 = vadd.f32 %v1064_v34, %v1056_v33 }
 0x2a8   : > { %v1066_v37 = vsub.f32 0.0, %v1065_v36 }
 0x2aa   : > { %v1075_v38 = vsel %vm1074_vm1, %v1066_v37, 0.0 }
 0x2ab   : > { %1076 = vst [vmem:[%s424_s0] sm:$0x1] %v1075_v38 }
 0x2ac PF: > { %p1401_p5 = scmp.ge.s32.totalorder %s1543_s24, 2  ;;  %s1108_s17 = sand.u32 1, %s1531_s21  }
 0x2ad   : > { %s1109_s19 = scalar_lea.sflag [#allocation5], %s1108_s17 }
 0x2ae   : > { %p1396_p1 = pnand %p1401_p5, %p1656_p6 }
 0x2b0   : > { %1526 = dma.done.wait (!%p1396_p1), %s1109_s19, 16  }
 0x2b1   : > { %1528 = vsyncadd (!%p1396_p1), %s1109_s19, 4294967280  ;;  %p25_p2 = scmp.ge.s32.totalorder %s1639_s25, 4   ;;  %s1958_s21 = smov %s1535_s22 }
 0x2b2   : > { %s1959_s22 = smov %s1539_s23  ;;  %s1960_s23 = smov %s1650_s28 }
 0x2b3   : > { %s1961_s24 = smov %s1639_s25  ;;  %27 = sbr.rel (!%p25_p2) target bundleno = 10 (0xa), region = 115 }
 0x2ba   :  { %1119 = vsyncpa [#allocation5], 1 }
 0x2bb   :  { %1121 = vsyncpa [#allocation5 + $0x1], 1 }
 0x2bc   :  { %1122 = vsyncpa [#allocation6], 1 }
 0x2bd   :  { %1124 = vsyncpa [#allocation6 + $0x1], 1 }

</bundles_post_ra>
